<compile_context>
chip_gen: v7x
topology: tpu7x:2x2x1
jax: 0.10.0
libtpu: 0.0.40
codegen_flags: <defaults>
</compile_context>

<pallas_src>
import jax
import jax.numpy as jnp
from jax.experimental import pallas as pl
from jax.experimental.pallas import tpu as pltpu  # noqa: F401  (TPU backend)

n_embd = 64
dropout = 0.2  # unused at inference


def _head_kernel(x_ref, w_ref, o_ref):
    # x_ref: (B*T, C)   flattened batch*time activations
    # w_ref: (C, 3H)    fused [Wq | Wk | Wv]
    # o_ref: (B, T, H)
    B, T, H = o_ref.shape
    C = x_ref.shape[-1]

    x = x_ref[...]
    w = w_ref[...]

    # One MXU pass for all three projections.
    qkv = jnp.dot(x, w, preferred_element_type=jnp.float32)       # (B*T, 3H) f32

    scale = jnp.float32(C) ** jnp.float32(-0.5)
    q = qkv[:, 0 * H:1 * H].reshape(B, T, H) * scale               # scale folded into q
    k = qkv[:, 1 * H:2 * H].reshape(B, T, H)
    v = qkv[:, 2 * H:3 * H].reshape(B, T, H)

    # Batched q @ k^T via contraction over H (no explicit transpose of k).
    wei = jnp.einsum('bqd,bkd->bqk', q, k,
                     preferred_element_type=jnp.float32)           # (B, T, T)

    # Numerically-stable softmax along the last axis, all in f32.
    wei_max = jnp.max(wei, axis=-1, keepdims=True)
    e = jnp.exp(wei - wei_max)
    denom = jnp.sum(e, axis=-1, keepdims=True)
    p = e * pl.reciprocal(denom, approx=False)

    # Dropout(p=0.2) on `p` is identity at inference.
    out = jnp.einsum('bqk,bkd->bqd', p, v,
                     preferred_element_type=jnp.float32)           # (B, T, H)
    o_ref[...] = out.astype(o_ref.dtype)


def head_forward(x, wk, wq, wv):
    """x: (B, T, C); wk/wq/wv: (C, H) (nn.Linear weight transposed).

    Returns (B, T, H) = softmax(q k^T / sqrt(C)) v."""
    B, T, C = x.shape
    H = wk.shape[1]

    # Fuse the three projection weights along the output dim: [Wq | Wk | Wv].
    w_qkv = jnp.concatenate([wq, wk, wv], axis=1)                  # (C, 3H)
    x2d = x.reshape(B * T, C)                                      # flatten batch*time

    return pl.pallas_call(
        _head_kernel,
        out_shape=jax.ShapeDtypeStruct((B, T, H), x.dtype),
        in_specs=[
            pl.BlockSpec((B * T, C), lambda: (0, 0)),
            pl.BlockSpec((C, 3 * H), lambda: (0, 0)),
        ],
        out_specs=pl.BlockSpec((B, T, H), lambda: (0, 0, 0)),
    )(x2d, w_qkv)


def _reference(x, wk, wq, wv):
    k = x @ wk
    q = x @ wq
    v = x @ wv
    wei = (q @ jnp.swapaxes(k, -2, -1)) * (x.shape[-1] ** -0.5)
    wei = jax.nn.softmax(wei, axis=-1)
    return wei @ v


if __name__ == "__main__":
    key = jax.random.PRNGKey(0)
    B, T, C = 2, 8, n_embd
    head_size = 16

    kx, kk, kq, kv = jax.random.split(key, 4)
    x = jax.random.normal(kx, (B, T, C), dtype=jnp.float32)

    # PyTorch-like Linear init U(-1/sqrt(C), 1/sqrt(C)), stored transposed
    # as (C, head_size) so the projection is x @ W.
    bound = 1.0 / (C ** 0.5)
    wk = jax.random.uniform(kk, (C, head_size), jnp.float32, -bound, bound)
    wq = jax.random.uniform(kq, (C, head_size), jnp.float32, -bound, bound)
    wv = jax.random.uniform(kv, (C, head_size), jnp.float32, -bound, bound)

    out = head_forward(x, wk, wq, wv)
    out = jax.block_until_ready(out)

    ref = _reference(x, wk, wq, wv)
    assert out.shape == (B, T, head_size)
    assert jnp.allclose(out, ref, atol=1e-5, rtol=1e-5), \
        f"max err {jnp.max(jnp.abs(out - ref))}"

    print("KERNEL_OK")
</pallas_src>

<mosaic_0001>
module attributes {stable_mosaic.version = 11 : i64} {
  func.func @_head_kernel(%arg0: memref<16x64xf32, #tpu.memory_space<vmem>>, %arg1: memref<64x48xf32, #tpu.memory_space<vmem>>, %arg2: memref<2x8x16xf32, #tpu.memory_space<vmem>>) attributes {dimension_semantics = [], scalar_prefetch = 0 : i64, scratch_operands = 0 : i64, tpu.core_type = #tpu.core_type<tc>} {
    %c0 = arith.constant 0 : index
    %c0_0 = arith.constant 0 : index
    %0 = vector.load %arg0[%c0, %c0_0] : memref<16x64xf32, #tpu.memory_space<vmem>>, vector<16x64xf32>
    %c0_1 = arith.constant 0 : index
    %c0_2 = arith.constant 0 : index
    %1 = vector.load %arg1[%c0_1, %c0_2] : memref<64x48xf32, #tpu.memory_space<vmem>>, vector<64x48xf32>
    %cst = arith.constant dense<0.000000e+00> : vector<16x48xf32>
    %2 = tpu.matmul %0, %1, %cst {dimension_numbers = #tpu.dot_dimension_numbers<[1], [0], [0], [1], [0, 0, 1, 1], [], []>} : vector<16x64xf32>, vector<64x48xf32>, vector<16x48xf32> -> vector<16x48xf32>
    %cst_3 = arith.constant 6.400000e+01 : f32
    %cst_4 = arith.constant -5.000000e-01 : f32
    %3 = math.powf %cst_3, %cst_4 : f32
    %4 = vector.extract_strided_slice %2 {offsets = [0, 0], sizes = [16, 16], strides = [1, 1]} : vector<16x48xf32> to vector<16x16xf32>
    %5 = vector.shape_cast %4 : vector<16x16xf32> to vector<2x8x16xf32>
    %6 = vector.broadcast %3 : f32 to vector<2x8x16xf32>
    %7 = arith.mulf %5, %6 : vector<2x8x16xf32>
    %8 = vector.extract_strided_slice %2 {offsets = [0, 16], sizes = [16, 16], strides = [1, 1]} : vector<16x48xf32> to vector<16x16xf32>
    %9 = vector.shape_cast %8 : vector<16x16xf32> to vector<2x8x16xf32>
    %10 = vector.extract_strided_slice %2 {offsets = [0, 32], sizes = [16, 16], strides = [1, 1]} : vector<16x48xf32> to vector<16x16xf32>
    %11 = vector.shape_cast %10 : vector<16x16xf32> to vector<2x8x16xf32>
    "tpu.trace_start"() <{level = 10 : i32, message = "bqd,bkd->bqk"}> : () -> ()
    %cst_5 = arith.constant dense<0.000000e+00> : vector<2x8x8xf32>
    %12 = tpu.matmul %7, %9, %cst_5 {dimension_numbers = #tpu.dot_dimension_numbers<[2], [2], [1], [1], [0, 0, 0, 1, 1, 1], [0], [0]>} : vector<2x8x16xf32>, vector<2x8x16xf32>, vector<2x8x8xf32> -> vector<2x8x8xf32>
    "tpu.trace_stop"() : () -> ()
    %cst_6 = arith.constant dense<0xFF800000> : vector<2x8xf32>
    %13 = vector.multi_reduction <maximumf>, %12, %cst_6 [2] : vector<2x8x8xf32> to vector<2x8xf32>
    %14 = vector.shape_cast %13 : vector<2x8xf32> to vector<2x8x1xf32>
    %15 = vector.broadcast %14 : vector<2x8x1xf32> to vector<2x8x8xf32>
    %16 = arith.subf %12, %15 : vector<2x8x8xf32>
    %17 = math.exp %16 : vector<2x8x8xf32>
    %cst_7 = arith.constant dense<0.000000e+00> : vector<2x8xf32>
    %18 = vector.multi_reduction <add>, %17, %cst_7 [2] : vector<2x8x8xf32> to vector<2x8xf32>
    %19 = vector.shape_cast %18 : vector<2x8xf32> to vector<2x8x1xf32>
    %20 = tpu.reciprocal %19 : vector<2x8x1xf32> -> vector<2x8x1xf32>
    %21 = vector.broadcast %20 : vector<2x8x1xf32> to vector<2x8x8xf32>
    %22 = arith.mulf %17, %21 : vector<2x8x8xf32>
    "tpu.trace_start"() <{level = 10 : i32, message = "bqk,bkd->bqd"}> : () -> ()
    %cst_8 = arith.constant dense<0.000000e+00> : vector<2x8x16xf32>
    %23 = tpu.matmul %22, %11, %cst_8 {dimension_numbers = #tpu.dot_dimension_numbers<[2], [1], [1], [2], [0, 0, 0, 1, 1, 2], [0], [0]>} : vector<2x8x8xf32>, vector<2x8x16xf32>, vector<2x8x16xf32> -> vector<2x8x16xf32>
    "tpu.trace_stop"() : () -> ()
    %c0_9 = arith.constant 0 : index
    %c0_10 = arith.constant 0 : index
    %c0_11 = arith.constant 0 : index
    %24 = vector.load %arg2[%c0_9, %c0_10, %c0_11] : memref<2x8x16xf32, #tpu.memory_space<vmem>>, vector<2x8x16xf32>
    tpu.vector_store %arg2[%c0_9, %c0_10, %c0_11], %23 {strides = array<i32>} : memref<2x8x16xf32, #tpu.memory_space<vmem>>, vector<2x8x16xf32>,
    return
  }
}

</mosaic_0001>

<bundles_post_ra>
// kernel: tpu_custom_call.1
= control target key start
LH: loop header
LB: loop body
LE: loop exit
PB: predicated region body
PF: predicated region fallthrough
CT: control target
= control target key end

     0   :  { %vm22_vm0 = vcmask 523264   ;;  %s658_s0 = inlined_call_operand.vmem [shape: f32[16,64], index: 0, kind: input, shape index: {}]   ;;  %s659_s1 = inlined_call_operand.vmem [shape: f32[64,48], index: 1, kind: input, shape index: {}]   ;;  %s660_s2 = inlined_call_operand.hbm [shape: f32[2,8,16], index: 2, kind: output, shape index: {}]  }
   0x1   :  { %v14_v0 = vld [vmem:[%s659_s1] sm:$0xff]  ;;  %v15_v1 = vld [vmem:[%s659_s1 + $0x8] sm:$0xff]  ;;  %v16_v2 = vld [vmem:[%s659_s1 + $0x10] sm:$0xff] }
   0x2   :  { %v521_v3 = vpack.c.bf16 %v15_v1, %v14_v0  ;;  %v17_v4 = vld [vmem:[%s659_s1 + $0x18] sm:$0xff]  ;;  %v18_v6 = vld [vmem:[%s659_s1 + $0x20] sm:$0xff]  ;;  %v19_v7 = vld [vmem:[%s659_s1 + $0x28] sm:$0xff] }
   0x3   :  { %v525_v5 = vpack.c.bf16 %v17_v4, %v16_v2  ;;  %v12_v8 = vld [vmem:[%s658_s0] sm:$0xff] }
   0x4   :  { %522 = vmatprep.subr.bf16.mxu0 %v521_v3  ;;  %498 = vmatprep.mubr.msk.f32.mxu0 %vm22_vm0, %v12_v8 }
   0x5   :  { %7 = vsyncpa [#allocation3], 0  ;;  %524 = vmatpush3.bf16.msra.mxu0 %v521_v3  ;;  %v529_v9 = vpack.c.bf16 %v19_v7, %v18_v6  ;;  %v20_v10 = vld [vmem:[%s659_s1 + $0x30] sm:$0xff]  ;;  %v21_v11 = vld [vmem:[%s659_s1 + $0x38] sm:$0xff]  ;;  %v576_v14 = vmov 0.0   ;;  %vm577_vm1 = vmmov 0  }
   0x6   :  { %526 = vmatprep.subr.bf16.mxu0 %v525_v5  ;;  %v533_v12 = vpack.c.bf16 %v21_v11, %v20_v10  ;;  %v13_v13 = vld [vmem:[%s658_s0 + $0x8] sm:$0xff]  ;;  %501 = vmatprep.subr.mxu1 %v576_v14  ;;  %s578_s1 = smov 112   ;;  %vm109_vm2 = vcmask 130048   ;;  %vm263_vm3 = vcmask 64512   ;;  %s579_s0 = smov 96  }
   0x7   :  { %503 = vmatprep.mubr.msk.f32.mxu1 %vm577_vm1, %v576_v14  ;;  %s580_s29 = smov [#allocation2]  }
   0x8   :  { %s445_s30 = sshll.u32 %s580_s29, 4  ;;  %s446_s30 = int_to_ptr.vmem [resolvable:$true] %s445_s30 }
   0x9   :  { %528 = vmatpush3.bf16.msra.mxu0 %v525_v5  ;;  %s552_s3 = scalar_lea.vmem %s446_s30, 256  ;;  %p557_p1 = scmp.lt.s32.totalorder %s446_s30, %s446_s30 }
   0xa   :  { %530 = vmatprep.subr.bf16.mxu0 %v529_v9  ;;  %p553_p0 = scmp.ne.s32.totalorder %s446_s30, %s552_s3  ;;  %p558_p2 = scmp.lt.s32.totalorder %s552_s3, %s552_s3 }
   0xc   :  { %p559_p3 = por %p558_p2, %p557_p1 }
   0xd   :  { %532 = vmatpush3.bf16.msra.mxu0 %v529_v9 }
   0xe   :  { %534 = vmatprep.subr.bf16.mxu0 %v533_v12  ;;  %p560_p4 = pnand %p559_p3, %p553_p0 }
  0x11   :  { %536 = vmatpush3.bf16.msra.mxu0 %v533_v12 }
  0x14   :  { %499 = vmatmul.mubr.msk.f32.vlgmr.msra.gmra.mrb[0].mxu0 %vm22_vm0, %v13_v13 }
  0xe7   :  { %v500_v15 = vpop.f32.mrb[0].mxu0 }
  0xe8   :  { %v95_v16 = vpop.f32.mrb[1].mxu0  ;;  %v105_v20 = vmul.f32 0.125, %v500_v15 }
  0xe9   :  { %107 = vrot.lane.b32.xlu0 %v95_v16, %s578_s1  ;;  %v104_v18 = vmul.f32 0.125, %v95_v16 }
  0xed   :  { %186 = vrot.lane.b32.xlu0 %v500_v15, %s578_s1 }
 0x15b   :  { %v108_v17 = vpop.permute.xlu0 %107 }
 0x15c   :  { %502 = vmatpush3.xpose.msk.msra.mxu1 %vm109_vm2, %v108_v17 }
 0x15d   :  { %506 = vmatprep.subr.mxu1 %v576_v14 }
 0x15f   :  { %v187_v19 = vpop.permute.xlu0 %186  ;;  %504 = vmatmul.mubr.msk.f32.vlgmr.msra.gmra.mrb[0].mxu1 %vm109_vm2, %v104_v18 }
 0x160   :  { %507 = vmatpush3.xpose.msk.msra.mxu1 %vm109_vm2, %v187_v19  ;;  %508 = vmatprep.mubr.msk.f32.mxu1 %vm577_vm1, %v576_v14 }
 0x161   :  { %511 = vmatprep.subr.mxu1 %v576_v14 }
 0x163   :  { %509 = vmatmul.mubr.msk.f32.vlgmr.msra.gmra.mrb[2].mxu1 %vm109_vm2, %v105_v20 }
 0x164   :  { %513 = vmatprep.mubr.msk.f32.mxu1 %vm577_vm1, %v576_v14 }
 0x232   :  { %v181_v21 = vpop.f32.mrb[0].mxu1 }
 0x233   :  { %v505_v22 = vpop.f32.mrb[1].mxu1  ;;  %v264_v23 = vsel %vm263_vm3, %v181_v21, -inf }
 0x234   :  { %265 = vmax.xlane.f32.xlu1 %v264_v23 }
 0x236   :  { %v259_v24 = vpop.f32.mrb[2].mxu1 }
 0x237   :  { %v510_v25 = vpop.f32.mrb[3].mxu1  ;;  %v267_v26 = vsel %vm263_vm3, %v259_v24, -inf }
 0x238   :  { %268 = vmax.xlane.f32.xlu1 %v267_v26 }
 0x249   :  { %286 = vrot.lane.b32.xlu1 %v95_v16, %s579_s0 }
 0x2c1   :  { %v266_v27 = vpop.xlane.xlu1 %265 }
 0x2c2   :  { %v270_v28 = vsub.f32 %v181_v21, %v266_v27 }
 0x2c4   :  { %v272_v29 = vmul.f32 1.442695, %v270_v28 }
 0x2c5   :  { %v269_v30 = vpop.xlane.xlu1 %268 }
 0x2c6   :  { %544 = vpow2.f32 %v272_v29  ;;  %v271_v31 = vsub.f32 %v259_v24, %v269_v30 }
 0x2c8   :  { %v274_v32 = vmul.f32 1.442695, %v271_v31 }
 0x2c9   :  { %v287_v33 = vpop.permute.xlu1 %286 }
 0x2ca   :  { %546 = vpow2.f32 %v274_v32  ;;  %512 = vmatpush3.msra.mxu1 %v287_v33 }
 0x2cb   :  { %516 = vmatprep.subr.mxu1 %v576_v14 }
 0x2d0   :  { %v545_v34 = vpop.eup %544 }
 0x2d1   :  { %v276_v35 = vsel %vm263_vm3, %v545_v34, 0.0 }
 0x2d2   :  { %277 = vadd.xlane.f32.xlu0 %v276_v35 }
 0x2d4   :  { %v547_v36 = vpop.eup %546 }
 0x2d5   :  { %v279_v37 = vsel %vm263_vm3, %v547_v36, 0.0 }
 0x2d6   :  { %280 = vadd.xlane.f32.xlu1 %v279_v37 }
 0x2e7   :  { %362 = vrot.lane.b32.xlu1 %v500_v15, %s579_s0 }
 0x35f   :  { %v278_v38 = vpop.xlane.xlu0 %277 }
 0x360   :  { %548 = vrcp.f32 %v278_v38 }
 0x363   :  { %v281_v39 = vpop.xlane.xlu1 %280 }
 0x364   :  { %550 = vrcp.f32 %v281_v39 }
 0x367   :  { %v363_v42 = vpop.permute.xlu1 %362 }
 0x36a   :  { %v549_v40 = vpop.eup %548 }
 0x36b   :  { %v284_v41 = vmul.f32 %v549_v40, %v545_v34 }
 0x36d   :  { %514 = vmatmul.mubr.msk.f32.vlgmr.msra.gmra.mrb[4].mxu1 %vm263_vm3, %v284_v41 }
 0x36e   :  { %v551_v43 = vpop.eup %550  ;;  %517 = vmatpush3.msra.mxu1 %v363_v42  ;;  %518 = vmatprep.mubr.msk.f32.mxu1 %vm577_vm1, %v576_v14 }
 0x36f   :  { %v285_v44 = vmul.f32 %v551_v43, %v547_v36 }
 0x371   :  { %519 = vmatmul.mubr.msk.f32.vlgmr.msra.gmra.mrb[6].mxu1 %vm263_vm3, %v285_v44 }
 0x440   :  { %v358_v45 = vpop.f32.mrb[4].mxu1 }
 0x441   :  { %438 = vst.msk [vmem:[#allocation2] sm:$0xff] %vm109_vm2, %v358_v45  ;;  %v515_v46 = vpop.f32.mrb[5].mxu1 }
 0x444   :  { %v434_v47 = vpop.f32.mrb[6].mxu1 }
 0x445   :  { %439 = vst.msk [vmem:[#allocation2 + $0x8] sm:$0xff] %vm109_vm2, %v434_v47  ;;  %v520_v48 = vpop.f32.mrb[7].mxu1 }
 0x446   :  { %563 = shalt.err (!%p560_p4)
}
 0x447   :  { %s564_s6 = scalar_lea.hbm %s660_s2, 256 }
 0x448   :  { %p565_p5 = scmp.ne.s32.totalorder %s660_s2, %s564_s6  ;;  %p568_p6 = scmp.lt.u32.totalorder %s564_s6, %s660_s2 }
 0x44a   :  { %p570_p7 = pnand %p568_p6, %p565_p5 }
 0x44c   :  { %573 = shalt.err (!%p570_p7)
}
 0x44d   :  { %s581_s11 = smov 128   ;;  %s582_s12 = smov 8  }
 0x44e   :  { %451 = dma.vmem_to_hbm [thread:$0]  %s446_s30, 256, %s660_s2, [#allocation3], %s581_s11, %s581_s11, %s582_s12  }
 0x44f   :  { %574 = dma.done.wait [#allocation3], 256  }
 0x450   :  { %575 = vsyncadd [#allocation3], 4294967040 }
 0x451   :  { %455 = vsyncpa [#allocation3], 1 }

</bundles_post_ra>
